<compile_context>
chip_gen: v7x
topology: tpu7x:2x2x1
jax: 0.10.0
libtpu: 0.0.40
codegen_flags: <defaults>
</compile_context>

<pallas_src>
import jax
import jax.numpy as jnp
from jax.experimental import pallas as pl
from jax.experimental.pallas import tpu as pltpu

HUBER_DELTA = 0.05


# --------------------------------------------------------------------------
# Pallas kernel: per-row-tile relu(zbuf) + partial loss reductions
# --------------------------------------------------------------------------
def loss_kernel(depth_ref_r, mask_r, rgb_ref_r,     # reference tiles
                zbuf_r, sil_r, color_r,             # "rendered" tiles
                stats_r, depth_out_r):              # outputs
    mask = mask_r[...]                              # (TILE_H, W) float32 {0,1}

    # depth = torch.relu(fragments.zbuf[..., 0])
    depth = jnp.maximum(zbuf_r[...], 0.0)
    depth_out_r[...] = depth

    # sil_loss = L1Loss()(silhouette, mask.float())       -> sum of |diff|
    sil_abs_sum = jnp.sum(jnp.abs(sil_r[...] - mask))

    # color_loss = MSELoss()(color, rgb_ref)              -> sum of sq diff
    cdiff = color_r[...] - rgb_ref_r[...]
    color_sq_sum = jnp.sum(cdiff * cdiff)

    # masked_select(depth, mask) vs masked_select(depth_ref, mask), Huber(0.05)
    # d is already zeroed outside the mask, and the quadratic branch (== 0)
    # is selected there, so no extra mask multiply is needed.
    d = (depth - depth_ref_r[...]) * mask
    abs_d = jnp.abs(d)
    quad = 0.5 * d * d
    lin = HUBER_DELTA * (abs_d - 0.5 * HUBER_DELTA)
    huber_sum = jnp.sum(jnp.where(abs_d < HUBER_DELTA, quad, lin))
    mask_count = jnp.sum(mask)

    # Pack the 4 per-tile partial sums into lanes 0..3 of a full (8,128)
    # block -> one unmasked lane-dense VMEM store, no scalar SMEM stores.
    lane = jax.lax.broadcasted_iota(jnp.int32, (8, 128), 1)
    sub = jax.lax.broadcasted_iota(jnp.int32, (8, 128), 0)
    first = sub == 0
    row = jnp.where(first & (lane == 0), sil_abs_sum, 0.0)
    row = jnp.where(first & (lane == 1), color_sq_sum, row)
    row = jnp.where(first & (lane == 2), huber_sum, row)
    row = jnp.where(first & (lane == 3), mask_count, row)
    stats_r[...] = row[None].astype(jnp.float32)


def _pick_tile_h(H, target=64):
    """Largest multiple-of-8 divisor of H not exceeding `target` (or H itself)."""
    if H <= target or H % 8 != 0:
        return H
    t = target - (target % 8)
    while t > 8 and H % t != 0:
        t -= 8
    return t if H % t == 0 else H


def pallas_calc_loss(depth_ref, sil_mask, rgb_ref, zbuf, silhouette, color,
                     tile_h=None):
    """Image tensors are (H, W); color/rgb_ref are (H, W, 3)."""
    H, W = depth_ref.shape
    rgb_ref2d = rgb_ref.reshape(H, W * 3)
    color2d = color.reshape(H, W * 3)

    if tile_h is None:
        tile_h = _pick_tile_h(H)
    assert H % tile_h == 0
    num_tiles = H // tile_h

    def chan_spec():
        return pl.BlockSpec((tile_h, W), lambda i: (i, 0))

    def rgb_spec():
        return pl.BlockSpec((tile_h, W * 3), lambda i: (i, 0))

    stats, depth = pl.pallas_call(
        loss_kernel,
        out_shape=(jax.ShapeDtypeStruct((num_tiles, 8, 128), jnp.float32),
                   jax.ShapeDtypeStruct((H, W), jnp.float32)),
        grid=(num_tiles,),
        in_specs=[chan_spec(), chan_spec(), rgb_spec(),
                  chan_spec(), chan_spec(), rgb_spec()],
        out_specs=(pl.BlockSpec((1, 8, 128), lambda i: (i, 0, 0)),
                   pl.BlockSpec((tile_h, W), lambda i: (i, 0))),
        compiler_params=pltpu.CompilerParams(
            dimension_semantics=("parallel",)),
    )(depth_ref, sil_mask, rgb_ref2d, zbuf, silhouette, color2d)

    # Tiny final reduction over tiles in JAX (lanes 0..3 of sublane 0).
    totals = jnp.sum(stats[:, 0, :4], axis=0)
    sil_abs_sum, color_sq_sum, huber_sum, mask_count = (
        totals[0], totals[1], totals[2], totals[3])

    sil_loss = sil_abs_sum / float(H * W)              # L1Loss mean
    color_loss = color_sq_sum / float(H * W * 3)       # MSELoss mean
    hloss = huber_sum / jnp.maximum(mask_count, 1.0)   # HuberLoss mean (guarded)
    loss = sil_loss + hloss + color_loss * 0.01
    return loss, depth


# --------------------------------------------------------------------------
# Glue: quaternion -> rotation matrix (PyTorch3D convention, real part first)
# --------------------------------------------------------------------------
def quaternion_to_matrix(q):
    r, i, j, k = q[..., 0], q[..., 1], q[..., 2], q[..., 3]
    two_s = 2.0 / jnp.sum(q * q, axis=-1)
    o = jnp.stack(
        [
            1 - two_s * (j * j + k * k), two_s * (i * j - k * r), two_s * (i * k + j * r),
            two_s * (i * j + k * r), 1 - two_s * (i * i + k * k), two_s * (j * k - i * r),
            two_s * (i * k - j * r), two_s * (j * k + i * r), 1 - two_s * (i * i + j * j),
        ],
        axis=-1,
    )
    return o.reshape(q.shape[:-1] + (3, 3))


# --------------------------------------------------------------------------
# Renderer proxy
# --------------------------------------------------------------------------
# TODO(synk): PyTorch3D mesh rasterization / SoftSilhouette / SoftPhong shading
# has no Pallas equivalent; emulated with a smooth deterministic function of
# (R, T) and the pixel grid so the loss kernel still depends on camera_position.
def synthetic_render(R, T, H, W):
    ys = jnp.linspace(-1.0, 1.0, H)
    xs = jnp.linspace(-1.0, 1.0, W)
    yy, xx = jnp.meshgrid(ys, xs, indexing="ij")
    dirs = jnp.stack([xx, yy, jnp.ones_like(xx)], axis=-1)        # (H, W, 3)
    rot = jnp.einsum("hwc,cd->hwd", dirs, R[0])                    # (H, W, 3)
    zbuf = rot[..., 2] + T[0, 2] - 0.3 * (xx * xx + yy * yy)       # (H, W)
    silhouette = jax.nn.sigmoid(4.0 * zbuf)                        # (H, W)
    color = jax.nn.sigmoid(rot + T[0][None, None, :])              # (H, W, 3)
    return zbuf, silhouette, color


# --------------------------------------------------------------------------
# Model forward
# --------------------------------------------------------------------------
def model_forward(camera_position, depth_ref, sil_mask, rgb_ref, H, W, tile_h):
    R = quaternion_to_matrix(camera_position[:, 3:])   # (1, 3, 3)
    T = camera_position[:, :3]                          # (1, 3)
    zbuf, silhouette, color = synthetic_render(R, T, H, W)
    loss, depth = pallas_calc_loss(depth_ref, sil_mask, rgb_ref,
                                   zbuf, silhouette, color, tile_h=tile_h)
    return loss, depth, color


if __name__ == "__main__":
    H, W = 128, 256      # small stand-in for the 512x512 render target
    TILE_H = 32          # -> 4 pipelined grid steps

    key = jax.random.PRNGKey(0)
    k_pose, k_depth = jax.random.split(key)

    # camera_position parameter: ground-truth pose + small deterministic noise
    cam_pose_gt = jnp.array([[0.0, 0.0, 2.7, 1.0, 0.0, 0.0, 0.0]], jnp.float32)
    camera_position = cam_pose_gt + 0.03 * jax.random.normal(k_pose, (1, 7))

    # reference buffers (depth_ref is a "patched" depth image: zero outside a
    # rectangular patch, like patch_image in the original script)
    yy_i = jnp.arange(H)[:, None]
    xx_i = jnp.arange(W)[None, :]
    patch = (yy_i >= 24) & (yy_i < 104) & (xx_i >= 64) & (xx_i < 192)
    base_depth = 2.5 + 0.1 * jax.random.normal(k_depth, (H, W))
    depth_ref = jnp.where(patch, base_depth, 0.0).astype(jnp.float32)
    sil_mask = (depth_ref != 0.0).astype(jnp.float32)          # silhouette_ref
    rgb_ref = jnp.zeros((H, W, 3), jnp.float32)                # np.zeros_like(rgb_full_ref)

    fwd = jax.jit(model_forward, static_argnums=(4, 5, 6))
    loss, depth, color = fwd(camera_position, depth_ref, sil_mask, rgb_ref,
                             H, W, TILE_H)
    jax.block_until_ready((loss, depth, color))

    assert loss.shape == ()
    assert depth.shape == (H, W)
    assert color.shape == (H, W, 3)
    assert bool(jnp.isfinite(loss))

    print("KERNEL_OK")
</pallas_src>

<mosaic_0001>
module attributes {stable_mosaic.version = 11 : i64} {
  func.func @loss_kernel(%arg0: i32, %arg1: memref<32x256xf32, #tpu.memory_space<vmem>>, %arg2: memref<32x256xf32, #tpu.memory_space<vmem>>, %arg3: memref<32x768xf32, #tpu.memory_space<vmem>>, %arg4: memref<32x256xf32, #tpu.memory_space<vmem>>, %arg5: memref<32x256xf32, #tpu.memory_space<vmem>>, %arg6: memref<32x768xf32, #tpu.memory_space<vmem>>, %arg7: memref<1x8x128xf32, #tpu.memory_space<vmem>>, %arg8: memref<32x256xf32, #tpu.memory_space<vmem>>) attributes {dimension_semantics = [#tpu.dimension_semantics<parallel>], iteration_bounds = array<i64: 4>, scalar_prefetch = 0 : i64, scratch_operands = 0 : i64, tpu.core_type = #tpu.core_type<tc>, window_params = [{transform_indices = @transform_0, window_bounds = array<i64: 32, 256>}, {transform_indices = @transform_1, window_bounds = array<i64: 32, 256>}, {transform_indices = @transform_2, window_bounds = array<i64: 32, 768>}, {transform_indices = @transform_3, window_bounds = array<i64: 32, 256>}, {transform_indices = @transform_4, window_bounds = array<i64: 32, 256>}, {transform_indices = @transform_5, window_bounds = array<i64: 32, 768>}, {transform_indices = @transform_6, window_bounds = array<i64: 1, 8, 128>}, {transform_indices = @transform_7, window_bounds = array<i64: 32, 256>}]} {
    %c0 = arith.constant 0 : index
    %c0_0 = arith.constant 0 : index
    %0 = vector.load %arg2[%c0, %c0_0] : memref<32x256xf32, #tpu.memory_space<vmem>>, vector<32x256xf32>
    %c0_1 = arith.constant 0 : index
    %c0_2 = arith.constant 0 : index
    %1 = vector.load %arg4[%c0_1, %c0_2] : memref<32x256xf32, #tpu.memory_space<vmem>>, vector<32x256xf32>
    %cst = arith.constant 0.000000e+00 : f32
    %2 = vector.broadcast %cst : f32 to vector<32x256xf32>
    %3 = arith.maximumf %1, %2 : vector<32x256xf32>
    %c0_3 = arith.constant 0 : index
    %c0_4 = arith.constant 0 : index
    %4 = vector.load %arg8[%c0_3, %c0_4] : memref<32x256xf32, #tpu.memory_space<vmem>>, vector<32x256xf32>
    tpu.vector_store %arg8[%c0_3, %c0_4], %3 {strides = array<i32>} : memref<32x256xf32, #tpu.memory_space<vmem>>, vector<32x256xf32>,
    %c0_5 = arith.constant 0 : index
    %c0_6 = arith.constant 0 : index
    %5 = vector.load %arg5[%c0_5, %c0_6] : memref<32x256xf32, #tpu.memory_space<vmem>>, vector<32x256xf32>
    %6 = arith.subf %5, %0 : vector<32x256xf32>
    %7 = math.absf %6 : vector<32x256xf32>
    %8 = vector.shape_cast %7 : vector<32x256xf32> to vector<1x32x256xf32>
    %cst_7 = arith.constant dense<0.000000e+00> : vector<1xf32>
    %9 = vector.multi_reduction <add>, %8, %cst_7 [1, 2] : vector<1x32x256xf32> to vector<1xf32>
    %10 = vector.shape_cast %9 : vector<1xf32> to vector<1x1x1xf32>
    %11 = vector.extract %10[0, 0, 0] : f32 from vector<1x1x1xf32>
    %c0_8 = arith.constant 0 : index
    %c0_9 = arith.constant 0 : index
    %12 = vector.load %arg6[%c0_8, %c0_9] : memref<32x768xf32, #tpu.memory_space<vmem>>, vector<32x768xf32>
    %c0_10 = arith.constant 0 : index
    %c0_11 = arith.constant 0 : index
    %13 = vector.load %arg3[%c0_10, %c0_11] : memref<32x768xf32, #tpu.memory_space<vmem>>, vector<32x768xf32>
    %14 = arith.subf %12, %13 : vector<32x768xf32>
    %15 = arith.mulf %14, %14 : vector<32x768xf32>
    %16 = vector.shape_cast %15 : vector<32x768xf32> to vector<1x32x768xf32>
    %cst_12 = arith.constant dense<0.000000e+00> : vector<1xf32>
    %17 = vector.multi_reduction <add>, %16, %cst_12 [1, 2] : vector<1x32x768xf32> to vector<1xf32>
    %18 = vector.shape_cast %17 : vector<1xf32> to vector<1x1x1xf32>
    %19 = vector.extract %18[0, 0, 0] : f32 from vector<1x1x1xf32>
    %c0_13 = arith.constant 0 : index
    %c0_14 = arith.constant 0 : index
    %20 = vector.load %arg1[%c0_13, %c0_14] : memref<32x256xf32, #tpu.memory_space<vmem>>, vector<32x256xf32>
    %21 = arith.subf %3, %20 : vector<32x256xf32>
    %22 = arith.mulf %21, %0 : vector<32x256xf32>
    %23 = math.absf %22 : vector<32x256xf32>
    %cst_15 = arith.constant 5.000000e-01 : f32
    %24 = vector.broadcast %cst_15 : f32 to vector<32x256xf32>
    %25 = arith.mulf %24, %22 : vector<32x256xf32>
    %26 = arith.mulf %25, %22 : vector<32x256xf32>
    %cst_16 = arith.constant 2.500000e-02 : f32
    %27 = vector.broadcast %cst_16 : f32 to vector<32x256xf32>
    %28 = arith.subf %23, %27 : vector<32x256xf32>
    %cst_17 = arith.constant 5.000000e-02 : f32
    %29 = vector.broadcast %cst_17 : f32 to vector<32x256xf32>
    %30 = arith.mulf %29, %28 : vector<32x256xf32>
    %cst_18 = arith.constant 5.000000e-02 : f32
    %31 = vector.broadcast %cst_18 : f32 to vector<32x256xf32>
    %32 = arith.cmpf olt, %23, %31 : vector<32x256xf32>
    %33 = arith.select %32, %26, %30 : vector<32x256xi1>, vector<32x256xf32>
    %34 = vector.shape_cast %33 : vector<32x256xf32> to vector<1x32x256xf32>
    %cst_19 = arith.constant dense<0.000000e+00> : vector<1xf32>
    %35 = vector.multi_reduction <add>, %34, %cst_19 [1, 2] : vector<1x32x256xf32> to vector<1xf32>
    %36 = vector.shape_cast %35 : vector<1xf32> to vector<1x1x1xf32>
    %37 = vector.extract %36[0, 0, 0] : f32 from vector<1x1x1xf32>
    %38 = vector.shape_cast %0 : vector<32x256xf32> to vector<1x32x256xf32>
    %cst_20 = arith.constant dense<0.000000e+00> : vector<1xf32>
    %39 = vector.multi_reduction <add>, %38, %cst_20 [1, 2] : vector<1x32x256xf32> to vector<1xf32>
    %40 = vector.shape_cast %39 : vector<1xf32> to vector<1x1x1xf32>
    %41 = vector.extract %40[0, 0, 0] : f32 from vector<1x1x1xf32>
    %42 = tpu.iota {dimensions = array<i32: 1>} : vector<8x128xi32>
    %43 = tpu.iota {dimensions = array<i32: 0>} : vector<8x128xi32>
    %c0_i32 = arith.constant 0 : i32
    %44 = vector.broadcast %c0_i32 : i32 to vector<8x128xi32>
    %45 = arith.cmpi eq, %43, %44 : vector<8x128xi32>
    %c0_i32_21 = arith.constant 0 : i32
    %46 = vector.broadcast %c0_i32_21 : i32 to vector<8x128xi32>
    %47 = arith.cmpi eq, %42, %46 : vector<8x128xi32>
    %48 = arith.andi %45, %47 : vector<8x128xi1>
    %cst_22 = arith.constant 0.000000e+00 : f32
    %49 = vector.broadcast %11 : f32 to vector<8x128xf32>
    %50 = vector.broadcast %cst_22 : f32 to vector<8x128xf32>
    %51 = arith.select %48, %49, %50 : vector<8x128xi1>, vector<8x128xf32>
    %c1_i32 = arith.constant 1 : i32
    %52 = vector.broadcast %c1_i32 : i32 to vector<8x128xi32>
    %53 = arith.cmpi eq, %42, %52 : vector<8x128xi32>
    %54 = arith.andi %45, %53 : vector<8x128xi1>
    %55 = vector.broadcast %19 : f32 to vector<8x128xf32>
    %56 = arith.select %54, %55, %51 : vector<8x128xi1>, vector<8x128xf32>
    %c2_i32 = arith.constant 2 : i32
    %57 = vector.broadcast %c2_i32 : i32 to vector<8x128xi32>
    %58 = arith.cmpi eq, %42, %57 : vector<8x128xi32>
    %59 = arith.andi %45, %58 : vector<8x128xi1>
    %60 = vector.broadcast %37 : f32 to vector<8x128xf32>
    %61 = arith.select %59, %60, %56 : vector<8x128xi1>, vector<8x128xf32>
    %c3_i32 = arith.constant 3 : i32
    %62 = vector.broadcast %c3_i32 : i32 to vector<8x128xi32>
    %63 = arith.cmpi eq, %42, %62 : vector<8x128xi32>
    %64 = arith.andi %45, %63 : vector<8x128xi1>
    %65 = vector.broadcast %41 : f32 to vector<8x128xf32>
    %66 = arith.select %64, %65, %61 : vector<8x128xi1>, vector<8x128xf32>
    %67 = vector.shape_cast %66 : vector<8x128xf32> to vector<1x8x128xf32>
    %c0_23 = arith.constant 0 : index
    %c0_24 = arith.constant 0 : index
    %c0_25 = arith.constant 0 : index
    %68 = vector.load %arg7[%c0_23, %c0_24, %c0_25] : memref<1x8x128xf32, #tpu.memory_space<vmem>>, vector<1x8x128xf32>
    tpu.vector_store %arg7[%c0_23, %c0_24, %c0_25], %67 {strides = array<i32>} : memref<1x8x128xf32, #tpu.memory_space<vmem>>, vector<1x8x128xf32>,
    return
  }
  func.func @transform_0(%arg0: i32) -> (i32, i32) {
    %c0_i32 = arith.constant 0 : i32
    %c0_i32_0 = arith.constant 0 : i32
    return %arg0, %c0_i32 : i32, i32
  }
  func.func @transform_1(%arg0: i32) -> (i32, i32) {
    %c0_i32 = arith.constant 0 : i32
    %c0_i32_0 = arith.constant 0 : i32
    return %arg0, %c0_i32 : i32, i32
  }
  func.func @transform_2(%arg0: i32) -> (i32, i32) {
    %c0_i32 = arith.constant 0 : i32
    %c0_i32_0 = arith.constant 0 : i32
    return %arg0, %c0_i32 : i32, i32
  }
  func.func @transform_3(%arg0: i32) -> (i32, i32) {
    %c0_i32 = arith.constant 0 : i32
    %c0_i32_0 = arith.constant 0 : i32
    return %arg0, %c0_i32 : i32, i32
  }
  func.func @transform_4(%arg0: i32) -> (i32, i32) {
    %c0_i32 = arith.constant 0 : i32
    %c0_i32_0 = arith.constant 0 : i32
    return %arg0, %c0_i32 : i32, i32
  }
  func.func @transform_5(%arg0: i32) -> (i32, i32) {
    %c0_i32 = arith.constant 0 : i32
    %c0_i32_0 = arith.constant 0 : i32
    return %arg0, %c0_i32 : i32, i32
  }
  func.func @transform_6(%arg0: i32) -> (i32, i32, i32) {
    %c0_i32 = arith.constant 0 : i32
    %c0_i32_0 = arith.constant 0 : i32
    %c0_i32_1 = arith.constant 0 : i32
    return %arg0, %c0_i32, %c0_i32_0 : i32, i32, i32
  }
  func.func @transform_7(%arg0: i32) -> (i32, i32) {
    %c0_i32 = arith.constant 0 : i32
    %c0_i32_0 = arith.constant 0 : i32
    return %arg0, %c0_i32 : i32, i32
  }
}

</mosaic_0001>

<bundles_post_ra>
// kernel: model_forward.1
= control target key start
LH: loop header
LB: loop body
LE: loop exit
PB: predicated region body
PF: predicated region fallthrough
CT: control target
= control target key end

     0   :  { %13 = vsyncpa [#allocation3], 0  ;;  %s1444_s0 = inlined_call_operand.vmem [shape: f32[128,256], index: 0, kind: input, shape index: {}]   ;;  %s1445_s1 = inlined_call_operand.vmem [shape: f32[128,256], index: 1, kind: input, shape index: {}]   ;;  %s1446_s2 = inlined_call_operand.vmem [shape: f32[128,768], index: 2, kind: input, shape index: {}]   ;;  %s1447_s3 = inlined_call_operand.vmem [shape: f32[128,256], index: 3, kind: input, shape index: {}]   ;;  %s1448_s4 = inlined_call_operand.vmem [shape: f32[128,256], index: 4, kind: input, shape index: {}]   ;;  %s1449_s5 = inlined_call_operand.vmem [shape: f32[128,768], index: 5, kind: input, shape index: {}]   ;;  %s1450_s6 = inlined_call_operand.vmem [shape: f32[4,8,128], index: 6, kind: output, shape index: {0}]   ;;  %s1451_s7 = inlined_call_operand.hbm [shape: f32[128,256], index: 7, kind: output, shape index: {1}]  }
   0x1   :  { %15 = vsyncpa [#allocation3 + $0x1], 0  ;;  %s1120_s24 = smov 0   ;;  %s1122_s25 = smov 0  }
   0x2   :  { %s1124_s26 = smov 0   ;;  %s1126_s27 = smov 0  }
   0x3 LB: > { %s1141_s28 = sadd.s32 4294967295, %s1075_s27   ;;  %s921_s29 = sadd.s32 4294967294, %s1075_s27   ;;  %s1075_s27 = sphi %s1126_s27, %s1471_s27   ;;  %s1071_s26 = sphi %s1124_s26, %s1470_s26   ;;  %s1067_s25 = sphi %s1122_s25, %s1469_s25   ;;  %s1063_s24 = sphi %s1120_s24, %s1468_s24  }
   0x4   : > { %s1145_s30 = sadd.s32 1, %s1075_s27   ;;  %s210_s8 = sadd.s32 1, %s1071_s26 }
   0x5   : > { %s207_s9 = ssub.s32 %s1075_s27, %s1145_s30  ;;  %p220_p0 = scmp.ne.s32.totalorder %s1071_s26, %s1067_s25 }
   0x6   : > { %p208_p1 = scmp.eq.s32.totalorder %s207_s9, 0  ;;  %p221_p2 = scmp.eq.s32.totalorder %s1141_s28, 3 }
   0x7   : > { %p226_p3 = scmp.ne.s32.totalorder %s1067_s25, %s1063_s24  ;;  %p227_p4 = scmp.eq.s32.totalorder %s921_s29, 3 }
   0x8   : > { %s1156_s10 = scalar_select %p208_p1, %s1071_s26, %s210_s8  }
   0x9   : > { %p1158_p5 = por %p221_p2, %p220_p0  ;;  %p1162_p6 = por %p227_p4, %p226_p3 }
   0xa   : > { %p924_p7 = scmp.ge.s32.totalorder %s1075_s27, 1  ;;  %p305_p8 = scmp.lt.s32.totalorder %s1075_s27, 5 }
   0xc   : > { %p306_p9 = pnand %p924_p7, %p305_p8 }
   0xd   : > { %s926_s13 = sshll.u32 (!%p306_p9), %s1141_s28, 2  ;;  %s369_s14 = sand.u32 (!%p306_p9), 1, %s1067_s25  }
   0xe   : > { %309 = sbr.rel (%p306_p9) target bundleno = 315 (0x13b), region = 44  ;;  %p373_p10 = scmp.lt.s32.totalorder (!%p306_p9), %s926_s13, 15 }
   0xf   : > { %s925_s19 = sshll.u32 (!%p306_p9), %s369_s14, 6  ;;  %s962_s29 = sshll.u32 (!%p306_p9), %s1141_s28, 10 }
  0x10   : > { %s1215_s20 = scalar_lea.vmem (!%p306_p9), [#allocation2], %s925_s19  ;;  %s1391_s16 = scalar_lea.hbm (!%p306_p9), %s1451_s7, %s962_s29 }
  0x15   : > { %s1473_s13 = smov (!%p373_p10, %s926_s13), 15 }
  0x16   : > { %s957_s15 = sshll.u32 %s1473_s13, 4 }
  0x17   : > { %s398_s18 = scalar_lea.vmem %s1447_s3, %s957_s15  ;;  %s1181_s22 = scalar_lea.vmem %s1445_s1, %s957_s15 }
  0x18   : > { %s1186_s8 = scalar_lea.vmem %s1448_s4, %s957_s15  ;;  %v427_v0 = vld [vmem:[%s398_s18] sm:$0xff]  ;;  %v1192_v2 = vld [vmem:[%s1181_s22 + $0x8] sm:$0xff]  ;;  %v429_v4 = vld [vmem:[%s398_s18 + $0x10] sm:$0xff]  ;;  %s1213_s17 = scalar_lea.vmem %s1444_s0, %s957_s15 }
  0x19   : > { %v1189_v1 = vld [vmem:[%s1181_s22] sm:$0xff]  ;;  %v428_v3 = vld [vmem:[%s398_s18 + $0x8] sm:$0xff]  ;;  %v430_v5 = vld [vmem:[%s398_s18 + $0x18] sm:$0xff]  ;;  %v435_v6 = vmax.f32 %v427_v0, 0.0  ;;  %v437_v13 = vmax.f32 %v429_v4, 0.0  ;;  %s963_s15 = smul.u32 48, %s1473_s13 }
  0x1a   : > { %v1195_v7 = vld [vmem:[%s1181_s22 + $0x10] sm:$0xff]  ;;  %v1198_v8 = vld [vmem:[%s1181_s22 + $0x18] sm:$0xff]  ;;  %v431_v9 = vld [vmem:[%s398_s18 + $0x20] sm:$0xff]  ;;  %v436_v12 = vmax.f32 %v428_v3, 0.0  ;;  %v438_v14 = vmax.f32 %v430_v5, 0.0 }
  0x1b   : > { %v1200_v10 = vld [vmem:[%s398_s18 + $0x28] sm:$0xff]  ;;  %v1202_v11 = vld [vmem:[%s398_s18 + $0x30] sm:$0xff]  ;;  %v1204_v15 = vld [vmem:[%s398_s18 + $0x38] sm:$0xff]  ;;  %v439_v16 = vmax.f32 %v431_v9, 0.0  ;;  %443 = vst [vmem:[%s1215_s20] sm:$0xff] %v435_v6  ;;  %s1297_s19 = scalar_lea.vmem %s1449_s5, %s963_s15  ;;  %s1304_s23 = scalar_lea.vmem %s1446_s2, %s963_s15 }
  0x1c   : > { %v440_v17 = vmax.f32 %v1200_v10, 0.0  ;;  %v441_v18 = vmax.f32 %v1202_v11, 0.0  ;;  %v451_v19 = vld [vmem:[%s1186_s8] sm:$0xff]  ;;  %v452_v20 = vld [vmem:[%s1186_s8 + $0x8] sm:$0xff]  ;;  %v442_v21 = vmax.f32 %v1204_v15, 0.0  ;;  %v453_v22 = vld [vmem:[%s1186_s8 + $0x10] sm:$0xff] }
  0x1d   : > { %v454_v23 = vld [vmem:[%s1186_s8 + $0x18] sm:$0xff]  ;;  %v455_v24 = vld [vmem:[%s1186_s8 + $0x20] sm:$0xff]  ;;  %v459_v25 = vsub.f32 %v451_v19, %v1189_v1  ;;  %v460_v26 = vsub.f32 %v452_v20, %v1192_v2  ;;  %444 = vst [vmem:[%s1215_s20 + $0x8] sm:$0xff] %v436_v12  ;;  %445 = vst [vmem:[%s1215_s20 + $0x10] sm:$0xff] %v437_v13  ;;  %v461_v29 = vsub.f32 %v453_v22, %v1195_v7  ;;  %s1398_s15 = scalar_lea.sflag [#allocation3], %s369_s14  ;;  %s1077_s18 = smov [#allocation2]  }
  0x1e   : > { %446 = vst [vmem:[%s1215_s20 + $0x18] sm:$0xff] %v438_v14  ;;  %v1228_v27 = vld [vmem:[%s1181_s22 + $0x20] sm:$0xff]  ;;  %v456_v28 = vld [vmem:[%s1186_s8 + $0x28] sm:$0xff]  ;;  %v462_v30 = vsub.f32 %v454_v23, %v1198_v8  ;;  %447 = vst [vmem:[%s1215_s20 + $0x20] sm:$0xff] %v439_v16 }
  0x1f   : > { %448 = vst [vmem:[%s1215_s20 + $0x28] sm:$0xff] %v440_v17  ;;  %449 = vst [vmem:[%s1215_s20 + $0x30] sm:$0xff] %v441_v18  ;;  %v467_v31 = vand.u32 2147483647, %v459_v25  ;;  %v619_v32 = vld [vmem:[%s1213_s17] sm:$0xff]  ;;  %v620_v33 = vld [vmem:[%s1213_s17 + $0x8] sm:$0xff]  ;;  %v463_v35 = vsub.f32 %v455_v24, %v1228_v27 }
  0x20   : > { %450 = vst [vmem:[%s1215_s20 + $0x38] sm:$0xff] %v442_v21  ;;  %v621_v34 = vld [vmem:[%s1213_s17 + $0x10] sm:$0xff]  ;;  %v468_v36 = vand.u32 2147483647, %v460_v26  ;;  %v469_v37 = vand.u32 2147483647, %v461_v29  ;;  %v627_v40 = vsub.f32 %v435_v6, %v619_v32  ;;  %v628_v41 = vsub.f32 %v436_v12, %v620_v33 }
  0x21   : > { %v1242_v38 = vld [vmem:[%s1181_s22 + $0x28] sm:$0xff]  ;;  %v457_v39 = vld [vmem:[%s1186_s8 + $0x30] sm:$0xff]  ;;  %v458_v42 = vld [vmem:[%s1186_s8 + $0x38] sm:$0xff]  ;;  %v470_v44 = vand.u32 2147483647, %v462_v30  ;;  %v629_v48 = vsub.f32 %v437_v13, %v621_v34  ;;  %v715_v6 = vadd.f32 %v1192_v2, %v1189_v1 }
  0x22   : > { %v464_v43 = vsub.f32 %v456_v28, %v1242_v38  ;;  %v475_v45 = vadd.f32 %v468_v36, %v467_v31  ;;  %v622_v46 = vld [vmem:[%s1213_s17 + $0x18] sm:$0xff]  ;;  %v623_v47 = vld [vmem:[%s1213_s17 + $0x20] sm:$0xff]  ;;  %v1250_v49 = vld [vmem:[%s1181_s22 + $0x30] sm:$0xff]  ;;  %v471_v54 = vand.u32 2147483647, %v463_v35  ;;  %v635_v60 = vmul.f32 %v627_v40, %v1189_v1 }
  0x23   : > { %v624_v50 = vld [vmem:[%s1213_s17 + $0x28] sm:$0xff]  ;;  %v630_v51 = vsub.f32 %v438_v14, %v622_v46  ;;  %v1254_v52 = vld [vmem:[%s1181_s22 + $0x38] sm:$0xff]  ;;  %v465_v53 = vsub.f32 %v457_v39, %v1250_v49  ;;  %v625_v56 = vld [vmem:[%s1213_s17 + $0x30] sm:$0xff]  ;;  %v631_v57 = vsub.f32 %v439_v16, %v623_v47  ;;  %v636_v61 = vmul.f32 %v628_v41, %v1192_v2 }
  0x24   : > { %v476_v55 = vadd.f32 %v475_v45, %v469_v37  ;;  %v466_v58 = vsub.f32 %v458_v42, %v1254_v52  ;;  %v626_v59 = vld [vmem:[%s1213_s17 + $0x38] sm:$0xff]  ;;  %v472_v62 = vand.u32 2147483647, %v464_v43  ;;  %v632_v0 = vsub.f32 %v440_v17, %v624_v50  ;;  %s775_s17 = sshll.u32 %s1215_s20, 4  ;;  %s1394_s17 = int_to_ptr.vmem [resolvable:$true] %s775_s17 }
  0x25   : > { %v637_v3 = vmul.f32 %v629_v48, %v1195_v7  ;;  %v633_v4 = vsub.f32 %v441_v18, %v625_v56  ;;  %v638_v5 = vmul.f32 %v630_v51, %v1198_v8  ;;  %v473_v9 = vand.u32 2147483647, %v465_v53  ;;  %s1013_s13 = scalar_lea.vmem %s1394_s17, 1024 }
  0x26   : > { %v477_v63 = vadd.f32 %v476_v55, %v470_v44  ;;  %v634_v11 = vsub.f32 %v442_v21, %v626_v59  ;;  %v639_v12 = vmul.f32 %v631_v57, %v1228_v27  ;;  %v643_v13 = vand.u32 2147483647, %v635_v60  ;;  %p1014_p11 = scmp.ne.s32.totalorder %s1394_s17, %s1013_s13 }
  0x27   : > { %v644_v14 = vand.u32 2147483647, %v636_v61  ;;  %v474_v15 = vand.u32 2147483647, %v466_v58  ;;  %v640_v19 = vmul.f32 %v632_v0, %v1242_v38  ;;  %v645_v17 = vand.u32 2147483647, %v637_v3 }
  0x28   : > { %v478_v10 = vadd.f32 %v477_v63, %v471_v54  ;;  %v1269_v20 = vmul.f32 %v633_v4, %v1250_v49  ;;  %v646_v18 = vand.u32 2147483647, %v638_v5  ;;  %v651_v22 = vmul.f32 0.5, %v635_v60  ;;  %p1015_p12 = pnand %p1014_p11, %p1158_p5 }
  0x29   : > { %v716_v23 = vadd.f32 %v715_v6, %v1195_v7  ;;  %v1273_v2 = vmul.f32 %v634_v11, %v1254_v52  ;;  %v647_v21 = vand.u32 2147483647, %v639_v12  ;;  %v652_v24 = vmul.f32 0.5, %v636_v61 }
  0x2a   : > { %v479_v16 = vadd.f32 %v478_v10, %v472_v62  ;;  %v653_v25 = vmul.f32 0.5, %v637_v3  ;;  %v943_v26 = vadd.f32 -0.025, %v643_v13  ;;  %v944_v28 = vadd.f32 -0.025, %v644_v14  ;;  %v491_v10 = vld [vmem:[%s1297_s19] sm:$0xff]  ;;  %p1016_p13 = pneg %p1015_p12 }
  0x2b   : > { %v648_v30 = vand.u32 2147483647, %v640_v19  ;;  %v654_v31 = vmul.f32 0.5, %v638_v5  ;;  %v945_v32 = vadd.f32 -0.025, %v645_v17  ;;  %v659_v34 = vmul.f32 %v651_v22, %v635_v60 }
  0x2c   : > { %v480_v1 = vadd.f32 %v479_v16, %v473_v9  ;;  %v649_v33 = vand.u32 2147483647, %v1269_v20  ;;  %v946_v35 = vadd.f32 -0.025, %v646_v18  ;;  %v717_v7 = vadd.f32 %v716_v23, %v1198_v8  ;;  %v493_v23 = vld [vmem:[%s1297_s19 + $0x10] sm:$0xff]  ;;  %v522_v8 = vld [vmem:[%s1304_s23 + $0x38] sm:$0xff] }
  0x2d   : > { %v650_v36 = vand.u32 2147483647, %v1273_v2  ;;  %v660_v37 = vmul.f32 %v652_v24, %v636_v61  ;;  %v675_v39 = vmul.f32 0.05, %v943_v26  ;;  %v676_v40 = vmul.f32 0.05, %v944_v28 }
  0x2e   : > { %v481_v29 = vadd.f32 %v480_v1, %v474_v15  ;;  %v655_v41 = vmul.f32 0.5, %v639_v12  ;;  %v661_v42 = vmul.f32 %v653_v25, %v637_v3  ;;  %v947_v43 = vadd.f32 -0.025, %v647_v21  ;;  %v516_v15 = vld [vmem:[%s1304_s23 + $0x8] sm:$0xff]  ;;  %v517_v1 = vld [vmem:[%s1304_s23 + $0x10] sm:$0xff]  ;;  %v494_v28 = vld [vmem:[%s1297_s19 + $0x18] sm:$0xff] }
  0x2f   : > { %v677_v44 = vmul.f32 0.05, %v945_v32  ;;  %v656_v45 = vmul.f32 0.5, %v640_v19  ;;  %v662_v46 = vmul.f32 %v654_v31, %v638_v5  ;;  %v948_v47 = vadd.f32 -0.025, %v648_v30 }
  0x30   : > { %482 = vadd.xlane.f32.xlu0 %v481_v29  ;;  %vm1279_vm0 = vcmp.lt.f32.partialorder %v643_v13, 0.05  ;;  %v678_v50 = vmul.f32 0.05, %v946_v35  ;;  %vm684_vm1 = vcmp.lt.f32.partialorder %v644_v14, 0.05  ;;  %v663_v56 = vmul.f32 %v655_v41, %v639_v12 }
  0x31   : > { %vm1283_vm2 = vcmp.lt.f32.partialorder %v645_v17, 0.05  ;;  %v691_v51 = vsel %vm1279_vm0, %v659_v34, %v675_v39  ;;  %v657_v53 = vmul.f32 0.5, %v1269_v20  ;;  %vm1290_vm3 = vcmp.lt.f32.partialorder %v646_v18, 0.05  ;;  %v492_v13 = vld [vmem:[%s1297_s19 + $0x8] sm:$0xff] }
  0x32   : > { %v692_v55 = vsel %vm684_vm1, %v660_v37, %v676_v40  ;;  %v949_v57 = vadd.f32 -0.025, %v649_v33  ;;  %v679_v58 = vmul.f32 0.05, %v947_v43  ;;  %v693_v59 = vsel %vm1283_vm2, %v661_v42, %v677_v44  ;;  %v515_v14 = vld [vmem:[%s1304_s23] sm:$0xff]  ;;  %v518_v29 = vld [vmem:[%s1304_s23 + $0x18] sm:$0xff] }
  0x33   : > { %v658_v60 = vmul.f32 0.5, %v1273_v2  ;;  %vm1307_vm4 = vcmp.lt.f32.partialorder %v647_v21, 0.05  ;;  %v699_v62 = vadd.f32 %v692_v55, %v691_v51  ;;  %v718_v63 = vadd.f32 %v717_v7, %v1228_v27  ;;  %v519_v34 = vld [vmem:[%s1304_s23 + $0x20] sm:$0xff]  ;;  %v496_v39 = vld [vmem:[%s1297_s19 + $0x28] sm:$0xff]  ;;  %v497_v44 = vld [vmem:[%s1297_s19 + $0x30] sm:$0xff] }
  0x34   : > { %v664_v0 = vmul.f32 %v656_v45, %v640_v19  ;;  %v950_v3 = vadd.f32 -0.025, %v650_v36  ;;  %v680_v4 = vmul.f32 0.05, %v948_v47  ;;  %v694_v5 = vsel %vm1290_vm3, %v662_v46, %v678_v50  ;;  %v520_v40 = vld [vmem:[%s1304_s23 + $0x28] sm:$0xff]  ;;  %v521_v45 = vld [vmem:[%s1304_s23 + $0x30] sm:$0xff] }
  0x35   : > { %vm1314_vm5 = vcmp.lt.f32.partialorder %v648_v30, 0.05  ;;  %v700_v9 = vadd.f32 %v699_v62, %v693_v59  ;;  %v665_v11 = vmul.f32 %v657_v53, %v1269_v20  ;;  %v681_v12 = vmul.f32 0.05, %v949_v57  ;;  %v498_v50 = vld [vmem:[%s1297_s19 + $0x38] sm:$0xff]  ;;  %v499_v55 = vld [vmem:[%s1297_s19 + $0x40] sm:$0xff] }
  0x36   : > { %v695_v27 = vsel %vm1307_vm4, %v663_v56, %v679_v58  ;;  %vm1325_vm6 = vcmp.lt.f32.partialorder %v649_v33, 0.05  ;;  %v666_v17 = vmul.f32 %v658_v60, %v1273_v2  ;;  %v682_v18 = vmul.f32 0.05, %v950_v3  ;;  %v495_v33 = vld [vmem:[%s1297_s19 + $0x20] sm:$0xff]  ;;  %v524_v60 = vld [vmem:[%s1304_s23 + $0x48] sm:$0xff] }
  0x37   : > { %v701_v19 = vadd.f32 %v700_v9, %v694_v5  ;;  %v696_v20 = vsel %vm1314_vm5, %v664_v0, %v680_v4  ;;  %v719_v22 = vadd.f32 %v718_v63, %v1242_v38  ;;  %vm1335_vm7 = vcmp.lt.f32.partialorder %v650_v36, 0.05  ;;  %v523_v56 = vld [vmem:[%s1304_s23 + $0x40] sm:$0xff]  ;;  %v501_v0 = vld [vmem:[%s1297_s19 + $0x50] sm:$0xff]  ;;  %v502_v9 = vld [vmem:[%s1297_s19 + $0x58] sm:$0xff] }
  0x38   : > { %v539_v25 = vsub.f32 %v491_v10, %v515_v14  ;;  %v540_v26 = vsub.f32 %v492_v13, %v516_v15  ;;  %v697_v2 = vsel %vm1325_vm6, %v665_v11, %v681_v12  ;;  %v541_v38 = vsub.f32 %v493_v23, %v517_v1  ;;  %v525_v3 = vld [vmem:[%s1304_s23 + $0x50] sm:$0xff]  ;;  %v526_v10 = vld [vmem:[%s1304_s23 + $0x58] sm:$0xff]  ;;  %v503_v13 = vld [vmem:[%s1297_s19 + $0x60] sm:$0xff] }
  0x39   : > { %v702_v24 = vadd.f32 %v701_v19, %v695_v27  ;;  %v698_v31 = vsel %vm1335_vm7, %v666_v17, %v682_v18  ;;  %v720_v32 = vadd.f32 %v719_v22, %v1250_v49  ;;  %v542_v7 = vsub.f32 %v494_v28, %v518_v29  ;;  %v527_v14 = vld [vmem:[%s1304_s23 + $0x60] sm:$0xff]  ;;  %v504_v17 = vld [vmem:[%s1297_s19 + $0x68] sm:$0xff]  ;;  %v505_v1 = vld [vmem:[%s1297_s19 + $0x70] sm:$0xff] }
  0x3a   : > { %v563_v36 = vmul.f32 %v539_v25, %v539_v25  ;;  %v564_v37 = vmul.f32 %v540_v26, %v540_v26  ;;  %v543_v42 = vsub.f32 %v495_v33, %v519_v34  ;;  %v565_v43 = vmul.f32 %v541_v38, %v541_v38  ;;  %v528_v18 = vld [vmem:[%s1304_s23 + $0x68] sm:$0xff]  ;;  %v529_v21 = vld [vmem:[%s1304_s23 + $0x70] sm:$0xff]  ;;  %v530_v28 = vld [vmem:[%s1304_s23 + $0x78] sm:$0xff] }
  0x3b   : > { %v703_v30 = vadd.f32 %v702_v24, %v696_v20  ;;  %v721_v49 = vadd.f32 %v720_v32, %v1254_v52  ;;  %v544_v46 = vsub.f32 %v496_v39, %v520_v40  ;;  %v566_v47 = vmul.f32 %v542_v7, %v542_v7  ;;  %v500_v52 = vld [vmem:[%s1297_s19 + $0x48] sm:$0xff]  ;;  %v531_v32 = vld [vmem:[%s1304_s23 + $0x80] sm:$0xff] }
  0x3c   : > { %v587_v48 = vadd.f32 %v564_v37, %v563_v36  ;;  %v545_v51 = vsub.f32 %v497_v44, %v521_v45  ;;  %v567_v53 = vmul.f32 %v543_v42, %v543_v42  ;;  %v546_v57 = vsub.f32 %v498_v50, %v522_v8  ;;  %v508_v7 = vld [vmem:[%s1297_s19 + $0x88] sm:$0xff]  ;;  %v533_v42 = vld [vmem:[%s1304_s23 + $0x90] sm:$0xff]  ;;  %v511_v8 = vld [vmem:[%s1297_s19 + $0xa0] sm:$0xff] }
  0x3d   : > { %v704_v35 = vadd.f32 %v703_v30, %v697_v2  ;;  %v568_v58 = vmul.f32 %v544_v46, %v544_v46  ;;  %v547_v61 = vsub.f32 %v499_v55, %v523_v56  ;;  %v548_v4 = vsub.f32 %v500_v52, %v524_v60  ;;  %v506_v2 = vld [vmem:[%s1297_s19 + $0x78] sm:$0xff]  ;;  %v532_v36 = vld [vmem:[%s1304_s23 + $0x88] sm:$0xff]  ;;  %v513_v60 = vld [vmem:[%s1297_s19 + $0xb0] sm:$0xff] }
  0x3e   : > { %v588_v54 = vadd.f32 %v587_v48, %v565_v43  ;;  %v569_v62 = vmul.f32 %v545_v51, %v545_v51  ;;  %v570_v5 = vmul.f32 %v546_v57, %v546_v57  ;;  %v549_v11 = vsub.f32 %v501_v0, %v525_v3  ;;  %v534_v46 = vld [vmem:[%s1304_s23 + $0x98] sm:$0xff]  ;;  %v535_v51 = vld [vmem:[%s1304_s23 + $0xa0] sm:$0xff]  ;;  %v512_v56 = vld [vmem:[%s1297_s19 + $0xa8] sm:$0xff] }
  0x3f   : > { %v705_v41 = vadd.f32 %v704_v35, %v698_v31  ;;  %v571_v12 = vmul.f32 %v547_v61, %v547_v61  ;;  %v550_v15 = vsub.f32 %v502_v9, %v526_v10  ;;  %v572_v16 = vmul.f32 %v548_v4, %v548_v4  ;;  %v507_v31 = vld [vmem:[%s1297_s19 + $0x80] sm:$0xff]  ;;  %v536_v57 = vld [vmem:[%s1304_s23 + $0xa8] sm:$0xff]  ;;  %v537_v61 = vld [vmem:[%s1304_s23 + $0xb0] sm:$0xff] }
  0x40   : > { %v589_v59 = vadd.f32 %v588_v54, %v566_v47  ;;  %v551_v20 = vsub.f32 %v503_v13, %v527_v14  ;;  %v573_v22 = vmul.f32 %v549_v11, %v549_v11  ;;  %v552_v24 = vsub.f32 %v504_v17, %v528_v18  ;;  %v514_v3 = vld [vmem:[%s1297_s19 + $0xb8] sm:$0xff] }
  0x41   : > { %706 = vadd.xlane.f32.xlu1 %v705_v41  ;;  %v574_v25 = vmul.f32 %v550_v15, %v550_v15  ;;  %v553_v29 = vsub.f32 %v505_v1, %v529_v21  ;;  %v554_v33 = vsub.f32 %v506_v2, %v530_v28  ;;  %v555_v37 = vsub.f32 %v507_v31, %v531_v32  ;;  %v509_v41 = vld [vmem:[%s1297_s19 + $0x90] sm:$0xff]  ;;  %v538_v4 = vld [vmem:[%s1304_s23 + $0xb8] sm:$0xff] }
  0x42   : > { %v590_v63 = vadd.f32 %v589_v59, %v567_v53  ;;  %v575_v30 = vmul.f32 %v551_v20, %v551_v20  ;;  %v576_v34 = vmul.f32 %v552_v24, %v552_v24  ;;  %v556_v43 = vsub.f32 %v508_v7, %v532_v36 }
  0x43   : > { %v577_v39 = vmul.f32 %v553_v29, %v553_v29  ;;  %v578_v44 = vmul.f32 %v554_v33, %v554_v33  ;;  %v557_v47 = vsub.f32 %v509_v41, %v533_v42  ;;  %v579_v48 = vmul.f32 %v555_v37, %v555_v37 }
  0x44   : > { %v591_v6 = vadd.f32 %v590_v63, %v568_v58  ;;  %v580_v54 = vmul.f32 %v556_v43, %v556_v43  ;;  %v559_v58 = vsub.f32 %v511_v8, %v535_v51  ;;  %v562_v10 = vsub.f32 %v514_v3, %v538_v4 }
  0x45   : > { %722 = vadd.xlane.f32.xlu1 %v721_v49  ;;  %v510_v49 = vld [vmem:[%s1297_s19 + $0x98] sm:$0xff]  ;;  %v581_v59 = vmul.f32 %v557_v47, %v557_v47  ;;  %s1017_s19 = sshll.u32 %s1077_s18, 4  ;;  %s1018_s19 = int_to_ptr.vmem [resolvable:$false] %s1017_s19 }
  0x46   : > { %v592_v27 = vadd.f32 %v591_v6, %v569_v62  ;;  %v558_v53 = vsub.f32 %v510_v49, %v534_v46  ;;  %v560_v62 = vsub.f32 %v512_v56, %v536_v57  ;;  %v583_v6 = vmul.f32 %v559_v58, %v559_v58  ;;  %s1019_s21 = scalar_lea.vmem %s1018_s19, 2048  ;;  %p1020_p0 = scmp.lt.s32.totalorder %s1394_s17, %s1018_s19 }
  0x47   : > { %v586_v14 = vmul.f32 %v562_v10, %v562_v10  ;;  %p1021_p1 = scmp.lt.s32.totalorder %s1019_s21, %s1013_s13 }
  0x48   : > { %v593_v19 = vadd.f32 %v592_v27, %v570_v5  ;;  %v582_v63 = vmul.f32 %v558_v53, %v558_v53  ;;  %v561_v5 = vsub.f32 %v513_v60, %v537_v61  ;;  %v584_v11 = vmul.f32 %v560_v62, %v560_v62 }
  0x49   : > { %p1022_p2 = por %p1021_p1, %p1020_p0 }
  0x4a   : > { %v594_v23 = vadd.f32 %v593_v19, %v571_v12  ;;  %v585_v27 = vmul.f32 %v561_v5, %v561_v5 }
  0x4b   : > { %p1023_p3 = pnand %p1022_p2, %p1016_p13 }
  0x4c   : > { %v595_v26 = vadd.f32 %v594_v23, %v572_v16 }
  0x4e   : > { %v596_v38 = vadd.f32 %v595_v26, %v573_v22 }
  0x50   : > { %v597_v35 = vadd.f32 %v596_v38, %v574_v25 }
  0x52   : > { %v598_v40 = vadd.f32 %v597_v35, %v575_v30 }
  0x54   : > { %v599_v45 = vadd.f32 %v598_v40, %v576_v34 }
  0x56   : > { %v600_v50 = vadd.f32 %v599_v45, %v577_v39 }
  0x58   : > { %v601_v55 = vadd.f32 %v600_v50, %v578_v44 }
  0x5a   : > { %v602_v52 = vadd.f32 %v601_v55, %v579_v48 }
  0x5c   : > { %v603_v0 = vadd.f32 %v602_v52, %v580_v54 }
  0x5e   : > { %v604_v9 = vadd.f32 %v603_v0, %v581_v59 }
  0x60   : > { %v605_v12 = vadd.f32 %v604_v9, %v582_v63 }
  0x62   : > { %v606_v13 = vadd.f32 %v605_v12, %v583_v6 }
  0x64   : > { %v607_v15 = vadd.f32 %v606_v13, %v584_v11 }
  0x66   : > { %v608_v16 = vadd.f32 %v607_v15, %v585_v27 }
  0x68   : > { %v609_v19 = vadd.f32 %v608_v16, %v586_v14 }
  0x6a   : > { %610 = vadd.xlane.f32.xlu0 %v609_v19 }
  0xbd   : > { %v483_v17 = vpop.xlane.xlu0 %482 }
  0xbe   : > { %v484_v18 = vrot.slane %v483_v17, 4 }
  0xc0   : > { %v485_v20 = vadd.f32 %v484_v18, %v483_v17 }
  0xc2   : > { %v486_v22 = vrot.slane %v485_v20, 2 }
  0xc4   : > { %v487_v23 = vadd.f32 %v486_v22, %v485_v20 }
  0xc6   : > { %v488_v1 = vrot.slane %v487_v23, 1 }
  0xc7   : > { %1026 = shalt.err (!%p1023_p3)
}
  0xc8   : > { %s1027_s14 = scalar_lea.hbm %s1391_s16, 1024  ;;  %s1031_s23 = scalar_lea.hbm %s1451_s7, 4096 }
  0xc9   : > { %p1028_p4 = scmp.ne.s32.totalorder %s1391_s16, %s1027_s14  ;;  %p1032_p9 = scmp.lt.u32.totalorder %s1391_s16, %s1451_s7 }
  0xca   : > { %p1033_p10 = scmp.lt.u32.totalorder %s1031_s23, %s1027_s14  ;;  %p1035_p12 = scmp.lt.u32.totalorder %s1027_s14, %s1391_s16 }
  0xcb   : > { %p1029_p7 = pnand %p1028_p4, %p1158_p5 }
  0xcc   : > { %p1034_p11 = por %p1033_p10, %p1032_p9 }
  0xcd   : > { %p1030_p8 = pneg %p1029_p7 }
  0xce   : > { %p1036_p13 = por %p1035_p12, %p1034_p11 }
  0xd0   : > { %p1037_p0 = pnand %p1036_p13, %p1030_p8 }
  0xd2   : > { %1040 = shalt.err (!%p1037_p0)
}
  0xd3   : > { %s1078_s9 = smov 256   ;;  %s1079_s13 = smov 16   ;;  %v489_v21 = vadd.f32 %v488_v1, %v487_v23  ;;  %v707_v24 = vpop.xlane.xlu1 %706  ;;  %v731_v44 = vlaneseq }
  0xd4   : > { %972 = dma.vmem_to_hbm [thread:$0]  (%p1158_p5), %s1394_s17, 1024, %s1391_s16, %s1398_s15, %s1078_s9, %s1078_s9, %s1079_s13   ;;  %v708_v26 = vrot.slane %v707_v24, 4 }
  0xd5   : > { %964 = vpush %v489_v21  ;;  %p414_p5 = scmp.lt.s32.totalorder %s1141_s28, 3  ;;  %v732_v45 = vand.u32 127, %v731_v44  ;;  %v734_v49 = vshrl.u32 %v731_v44, 7 }
  0xd6   : > { %v709_v28 = vadd.f32 %v708_v26, %v707_v24 }
  0xd7   : > { %v723_v25 = vpop.xlane.xlu1 %722  ;;  %s1475_s28 = smov (!%p414_p5, %s1141_s28), 3  ;;  %vm735_vm8 = vcmp.eq.s32.totalorder %v734_v49, 0  ;;  %vm736_vm9 = vcmp.eq.s32.totalorder %v732_v45, 0  ;;  %vm740_vm10 = vcmp.eq.s32.totalorder %v732_v45, 1  ;;  %vm744_vm11 = vcmp.eq.s32.totalorder %v732_v45, 2 }
  0xd8   : > { %v724_v2 = vrot.slane %v723_v25, 4  ;;  %v710_v30 = vrot.slane %v709_v28, 2  ;;  %vm737_vm12 = vmand %vm735_vm8, %vm736_vm9  ;;  %vm748_vm13 = vcmp.eq.s32.totalorder %v732_v45, 3  ;;  %s942_s16 = sshll.u32 %s1475_s28, 3 }
  0xd9   : > { %vm741_vm14 = vmand %vm735_vm8, %vm740_vm10  ;;  %s417_s21 = scalar_lea.vmem %s1450_s6, %s942_s16 }
  0xda   : > { %v725_v29 = vadd.f32 %v724_v2, %v723_v25  ;;  %v711_v34 = vadd.f32 %v710_v30, %v709_v28  ;;  %vm745_vm15 = vmand %vm735_vm8, %vm744_vm11 }
  0xdb   : > { %vm749_vm0 = vmand %vm735_vm8, %vm748_vm13 }
  0xdc   : > { %v726_v31 = vrot.slane %v725_v29, 2  ;;  %v712_v37 = vrot.slane %v711_v34, 1 }
  0xde   : > { %v727_v35 = vadd.f32 %v726_v31, %v725_v29  ;;  %v713_v42 = vadd.f32 %v712_v37, %v711_v34 }
  0xe0   : > { %v728_v40 = vrot.slane %v727_v35, 1 }
  0xe2   : > { %v729_v43 = vadd.f32 %v728_v40, %v727_v35 }
  0xf7   : > { %v611_v38 = vpop.xlane.xlu0 %610 }
  0xf8   : > { %v612_v32 = vrot.slane %v611_v38, 4 }
  0xfa   : > { %v613_v33 = vadd.f32 %v612_v32, %v611_v38 }
  0xfc   : > { %v614_v7 = vrot.slane %v613_v33, 2 }
  0xfe   : > { %v615_v36 = vadd.f32 %v614_v7, %v613_v33 }
 0x100   : > { %v616_v39 = vrot.slane %v615_v36, 1 }
 0x102   : > { %v617_v41 = vadd.f32 %v616_v39, %v615_v36 }
 0x104   : > { %966 = vpush %v617_v41 }
 0x105   : > { %968 = vpush %v713_v42 }
 0x106   : > { %970 = vpush %v729_v43  ;;  %s965_s11 = spop %964 }
 0x107   : > { %v738_v46 = vstv %s965_s11 }
 0x108   : > { %v739_v47 = vsel %vm737_vm12, %v738_v46, 0.0 }
 0x135   : > { %s967_s17 = spop %966 }
 0x136   : > { %v742_v48 = vstv %s967_s17  ;;  %s969_s15 = spop %968 }
 0x137   : > { %v743_v50 = vsel %vm741_vm14, %v742_v48, %v739_v47  ;;  %v746_v8 = vstv %s969_s15  ;;  %s971_s14 = spop %970 }
 0x138   : > { %v747_v51 = vsel %vm745_vm15, %v746_v8, %v743_v50  ;;  %v750_v53 = vstv %s971_s14 }
 0x139   : > { %v751_v54 = vsel %vm749_vm0, %v750_v53, %v747_v51 }
 0x13a   : > { %752 = vst [vmem:[%s417_s21] sm:$0xff] %v751_v54 }
 0x13b PF: > { %p978_p1 = scmp.ge.s32.totalorder %s1075_s27, 2  ;;  %s797_s28 = sand.u32 1, %s1063_s24  }
 0x13c   : > { %s798_s20 = scalar_lea.sflag [#allocation3], %s797_s28 }
 0x13d   : > { %p975_p2 = pnand %p978_p1, %p1162_p6 }
 0x13f   : > { %1058 = dma.done.wait (!%p975_p2), %s798_s20, 1024  }
 0x140   : > { %1060 = vsyncadd (!%p975_p2), %s798_s20, 4294966272  ;;  %p18_p3 = scmp.ge.s32.totalorder %s1145_s30, 6   ;;  %s1468_s24 = smov %s1067_s25 }
 0x141   : > { %s1469_s25 = smov %s1071_s26  ;;  %s1470_s26 = smov %s1156_s10 }
 0x142   : > { %s1471_s27 = smov %s1145_s30  ;;  %20 = sbr.rel (!%p18_p3) target bundleno = 3 (0x3), region = 106 }
 0x149   :  { %803 = vsyncpa [#allocation3], 1 }
 0x14a   :  { %805 = vsyncpa [#allocation3 + $0x1], 1 }

</bundles_post_ra>
